<compile_context>
chip_gen: v7x
topology: tpu7x:2x2x1
jax: 0.10.0
libtpu: 0.0.40
codegen_flags: <defaults>
</compile_context>

<pallas_src>
import math

import jax
import jax.numpy as jnp
from jax import lax
from jax.experimental import pallas as pl
from jax.experimental.pallas import tpu as pltpu


def _pick_tile(dim, candidates=(512, 256, 128)):
    for c in candidates:
        if dim % c == 0:
            return c
    return dim  # tiny dims: full extent (allowed — block dim equals array dim)


# ---------------------------------------------------------------------------
# Generic tiled matmul (fused QKV projection & fused output projection).
# ---------------------------------------------------------------------------
def _matmul_kernel(x_ref, w_ref, o_ref, acc_ref):
    @pl.when(pl.program_id(2) == 0)
    def _():
        acc_ref[...] = jnp.zeros_like(acc_ref)

    acc_ref[...] += jnp.dot(x_ref[...], w_ref[...],
                            preferred_element_type=jnp.float32)

    @pl.when(pl.program_id(2) == pl.num_programs(2) - 1)
    def _():
        o_ref[...] = acc_ref[...].astype(o_ref.dtype)


def _matmul(x, w, out_dtype):
    M, K = x.shape
    K2, N = w.shape
    assert K == K2
    tm, tn, tk = _pick_tile(M), _pick_tile(N), _pick_tile(K)
    in_bytes = jnp.dtype(x.dtype).itemsize
    cost = pl.CostEstimate(
        flops=2 * M * N * K,
        transcendentals=0,
        bytes_accessed=(M * K + K * N) * in_bytes
        + M * N * jnp.dtype(out_dtype).itemsize)
    return pl.pallas_call(
        _matmul_kernel,
        out_shape=jax.ShapeDtypeStruct((M, N), out_dtype),
        grid_spec=pltpu.PrefetchScalarGridSpec(
            num_scalar_prefetch=0,
            grid=(M // tm, N // tn, K // tk),
            in_specs=[pl.BlockSpec((tm, tk), lambda i, j, k: (i, k)),
                      pl.BlockSpec((tk, tn), lambda i, j, k: (k, j))],
            out_specs=pl.BlockSpec((tm, tn), lambda i, j, k: (i, j)),
            scratch_shapes=[pltpu.VMEM((tm, tn), jnp.float32)]),
        compiler_params=pltpu.CompilerParams(
            dimension_semantics=("parallel", "parallel", "arbitrary")),
        cost_estimate=cost,
    )(x, w)


# ---------------------------------------------------------------------------
# Flash-style causal attention: grid = (batch*heads, q_tiles, k_tiles).
# Online softmax over the k axis; fully-masked key tiles are skipped.
# ---------------------------------------------------------------------------
def _flash_attn_kernel(q_ref, k_ref, v_ref, z_ref, m_sc, l_sc, acc_sc):
    qi = pl.program_id(1)
    ki = pl.program_id(2)
    tq = q_ref.shape[1]
    tk = k_ref.shape[1]

    @pl.when(ki == 0)
    def _():
        m_sc[...] = jnp.full_like(m_sc, -jnp.inf)
        l_sc[...] = jnp.zeros_like(l_sc)
        acc_sc[...] = jnp.zeros_like(acc_sc)

    q_start = qi * tq
    k_start = ki * tk

    # Causal skip: key tiles entirely above the diagonal contribute nothing.
    @pl.when(k_start <= q_start + tq - 1)
    def _():
        q = q_ref[0]                                   # (tq, Dh) — scale already in w_q
        k = k_ref[0]                                   # (tk, Dh)
        v = v_ref[0]                                   # (tk, Dh)

        # scores on the MXU, f32 accumulation, no explicit transpose of k
        s = lax.dot_general(q, k, (((1,), (1,)), ((), ())),
                            preferred_element_type=jnp.float32)   # (tq, tk)

        # causal mask (only non-trivial on the diagonal tile; cheap VPU work)
        row = q_start + lax.broadcasted_iota(jnp.int32, (tq, tk), 0)
        col = k_start + lax.broadcasted_iota(jnp.int32, (tq, tk), 1)
        s = jnp.where(col > row, -jnp.inf, s)

        # online softmax update (all f32)
        m_new = jnp.maximum(m_sc[...], jnp.max(s, axis=-1, keepdims=True))
        alpha = jnp.exp(m_sc[...] - m_new)
        p = jnp.exp(s - m_new)
        l_sc[...] = alpha * l_sc[...] + jnp.sum(p, axis=-1, keepdims=True)
        acc_sc[...] = alpha * acc_sc[...] + jnp.dot(
            p.astype(v.dtype), v, preferred_element_type=jnp.float32)
        m_sc[...] = m_new

    @pl.when(ki == pl.num_programs(2) - 1)
    def _():
        # Deferred normalization: one reciprocal of the (tq,1) row sums.
        # approx=False keeps the 1e-5 match with the f32 reference; switch to
        # approx=True in production (free EUP slot).
        inv_l = pl.reciprocal(l_sc[...], approx=False)
        z_ref[0] = (acc_sc[...] * inv_l).astype(z_ref.dtype)


def _flash_attention(q, k, v, *, tq, tk):
    BH, pos, d_head = q.shape
    n_q, n_k = pos // tq, pos // tk

    def q_map(b, qi, ki):
        return (b, qi, 0)

    def kv_map(b, qi, ki):
        # Clamp skipped (fully-masked) key tiles to the last active tile so the
        # pipeline does not re-DMA blocks that the kernel never reads.
        last_active = ((qi + 1) * tq - 1) // tk
        return (b, jnp.minimum(ki, last_active), 0)

    # cost estimate accounting for the causal skip
    active_tiles = sum(min(n_k, ((qi + 1) * tq - 1) // tk + 1) for qi in range(n_q))
    itemsize = jnp.dtype(q.dtype).itemsize
    cost = pl.CostEstimate(
        flops=BH * active_tiles * 4 * tq * tk * d_head,
        transcendentals=BH * active_tiles * tq * tk,
        bytes_accessed=BH * pos * d_head * 4 * itemsize)

    return pl.pallas_call(
        _flash_attn_kernel,
        out_shape=jax.ShapeDtypeStruct((BH, pos, d_head), q.dtype),
        grid_spec=pltpu.PrefetchScalarGridSpec(
            num_scalar_prefetch=0,
            grid=(BH, n_q, n_k),
            in_specs=[
                pl.BlockSpec((1, tq, d_head), q_map),
                pl.BlockSpec((1, tk, d_head), kv_map),
                pl.BlockSpec((1, tk, d_head), kv_map),
            ],
            out_specs=pl.BlockSpec((1, tq, d_head), q_map),
            scratch_shapes=[pltpu.VMEM((tq, 1), jnp.float32),       # running max
                            pltpu.VMEM((tq, 1), jnp.float32),       # running sum
                            pltpu.VMEM((tq, d_head), jnp.float32)]  # acc
        ),
        compiler_params=pltpu.CompilerParams(
            dimension_semantics=("parallel", "parallel", "arbitrary")),
        cost_estimate=cost,
    )(q, k, v)


def attention_forward(resid, w_q, w_k, w_v, w_o, *, tq=None, tk=None,
                      mxu_dtype=None):
    """resid: [batch, pos, d_model] -> [batch, pos, d_model] (causal MHA)."""
    batch, pos, d_model = resid.shape
    n_heads, _, d_head = w_q.shape
    if mxu_dtype is None:
        mxu_dtype = resid.dtype            # use jnp.bfloat16 in production
    scale = 1.0 / math.sqrt(d_head)

    # --- 1. fused QKV projection: one (B*P,Dm) @ (Dm,3*H*Dh) Pallas matmul ----
    def _flat(w):                          # (H, Dm, Dh) -> (Dm, H*Dh) head-major
        return jnp.transpose(w, (1, 0, 2)).reshape(d_model, n_heads * d_head)

    w_fused = jnp.concatenate(
        [_flat(w_q) * scale, _flat(w_k), _flat(w_v)], axis=1).astype(mxu_dtype)
    x2d = resid.reshape(batch * pos, d_model).astype(mxu_dtype)
    qkv = _matmul(x2d, w_fused, mxu_dtype)                       # (B*P, 3*H*Dh)
    qkv = qkv.reshape(batch, pos, 3, n_heads, d_head)
    qkv = jnp.transpose(qkv, (2, 0, 3, 1, 4)).reshape(
        3, batch * n_heads, pos, d_head)
    q, k, v = qkv[0], qkv[1], qkv[2]

    # --- 2. flash attention over (batch*heads, q_tiles, k_tiles) --------------
    if tq is None:
        tq = _pick_tile(pos, (256, 128))     # <=256 keeps v7x 64 MiB VMEM happy
    if tk is None:
        tk = _pick_tile(pos, (512, 256, 128))
    assert pos % tq == 0 and pos % tk == 0
    z = _flash_attention(q, k, v, tq=tq, tk=tk)                  # (B*H, P, Dh)

    # --- 3. fused output projection: single matmul with K = H*Dh --------------
    z2d = (z.reshape(batch, n_heads, pos, d_head)
             .transpose(0, 2, 1, 3)
             .reshape(batch * pos, n_heads * d_head))
    w_o_flat = w_o.reshape(n_heads * d_head, d_model).astype(mxu_dtype)
    out = _matmul(z2d, w_o_flat, resid.dtype)
    return out.reshape(batch, pos, d_model)


def _reference_attention(resid, w_q, w_k, w_v, w_o):
    d_head = w_q.shape[-1]
    qs = jnp.einsum("bpd,hdk->bhpk", resid, w_q)
    ks = jnp.einsum("bpd,hdk->bhpk", resid, w_k)
    vs = jnp.einsum("bpd,hdk->bhpk", resid, w_v)
    attn = jnp.einsum("bhqk,bhsk->bhqs", qs, ks)
    S = resid.shape[1]
    mask = jnp.triu(jnp.ones((S, S), dtype=bool), k=1)
    attn = jnp.where(mask, -jnp.inf, attn)
    attn = jax.nn.softmax(attn / math.sqrt(d_head), axis=-1)
    z = jnp.einsum("bhqs,bhsk->bhqk", attn, vs)
    return jnp.einsum("bhpk,hkd->bpd", z, w_o)


if __name__ == "__main__":
    # cfg: d_model=32, n_heads=4, d_head=8, init_range=0.02; batch=2, pos=8
    batch, pos, d_model, n_heads, d_head = 2, 8, 32, 4, 8
    init_range = 0.02

    key = jax.random.PRNGKey(0)
    kx, kq, kk, kv, ko = jax.random.split(key, 5)

    resid = jax.random.normal(kx, (batch, pos, d_model), dtype=jnp.float32)
    w_q = init_range * jax.random.normal(kq, (n_heads, d_model, d_head), dtype=jnp.float32)
    w_k = init_range * jax.random.normal(kk, (n_heads, d_model, d_head), dtype=jnp.float32)
    w_v = init_range * jax.random.normal(kv, (n_heads, d_model, d_head), dtype=jnp.float32)
    w_o = init_range * jax.random.normal(ko, (n_heads, d_head, d_model), dtype=jnp.float32)

    ref = _reference_attention(resid, w_q, w_k, w_v, w_o)

    # f32 MXU-input path: exact match against the f32 reference.
    out = attention_forward(resid, w_q, w_k, w_v, w_o)
    out = jax.block_until_ready(out)
    assert out.shape == (batch, pos, d_model)
    assert jnp.allclose(out, ref, atol=1e-5, rtol=1e-5), float(jnp.max(jnp.abs(out - ref)))

    # bf16 MXU-input path (production dtype): looser tolerance vs the f32 ref.
    out_bf16 = attention_forward(resid, w_q, w_k, w_v, w_o, mxu_dtype=jnp.bfloat16)
    out_bf16 = jax.block_until_ready(out_bf16)
    assert jnp.allclose(out_bf16, ref, atol=5e-3, rtol=5e-2), float(jnp.max(jnp.abs(out_bf16 - ref)))

    print("KERNEL_OK")
</pallas_src>

<mosaic_0001>
module attributes {stable_mosaic.version = 11 : i64} {
  func.func @_matmul_kernel(%arg0: i32, %arg1: i32, %arg2: i32, %arg3: memref<16x32xf32, #tpu.memory_space<vmem>>, %arg4: memref<32x96xf32, #tpu.memory_space<vmem>>, %arg5: memref<16x96xf32, #tpu.memory_space<vmem>>, %arg6: memref<16x96xf32, #tpu.memory_space<vmem>>) attributes {dimension_semantics = [#tpu.dimension_semantics<parallel>, #tpu.dimension_semantics<parallel>, #tpu.dimension_semantics<arbitrary>], iteration_bounds = array<i64: 1, 1, 1>, scalar_prefetch = 0 : i64, scratch_operands = 1 : i64, tpu.core_type = #tpu.core_type<tc>, window_params = [{transform_indices = @transform_0, window_bounds = array<i64: 16, 32>}, {transform_indices = @transform_1, window_bounds = array<i64: 32, 96>}, {transform_indices = @transform_2, window_bounds = array<i64: 16, 96>}]} {
    %c0_i32 = arith.constant 0 : i32
    %0 = arith.cmpi eq, %arg2, %c0_i32 : i32
    %1 = arith.extui %0 : i1 to i32
    %c0_i32_0 = arith.constant 0 : i32
    %2 = arith.cmpi ne, %1, %c0_i32_0 : i32
    scf.if %2 {
      %cst_10 = arith.constant 0.000000e+00 : f32
      %12 = vector.broadcast %cst_10 : f32 to vector<16x96xf32>
      %c0_11 = arith.constant 0 : index
      %c0_12 = arith.constant 0 : index
      %13 = vector.load %arg6[%c0_11, %c0_12] : memref<16x96xf32, #tpu.memory_space<vmem>>, vector<16x96xf32>
      tpu.vector_store %arg6[%c0_11, %c0_12], %12 {strides = array<i32>} : memref<16x96xf32, #tpu.memory_space<vmem>>, vector<16x96xf32>,
    } else {
    }
    %c0 = arith.constant 0 : index
    %c0_1 = arith.constant 0 : index
    %3 = vector.load %arg6[%c0, %c0_1] : memref<16x96xf32, #tpu.memory_space<vmem>>, vector<16x96xf32>
    %c0_2 = arith.constant 0 : index
    %c0_3 = arith.constant 0 : index
    %4 = vector.load %arg3[%c0_2, %c0_3] : memref<16x32xf32, #tpu.memory_space<vmem>>, vector<16x32xf32>
    %c0_4 = arith.constant 0 : index
    %c0_5 = arith.constant 0 : index
    %5 = vector.load %arg4[%c0_4, %c0_5] : memref<32x96xf32, #tpu.memory_space<vmem>>, vector<32x96xf32>
    %cst = arith.constant dense<0.000000e+00> : vector<16x96xf32>
    %6 = tpu.matmul %4, %5, %cst {dimension_numbers = #tpu.dot_dimension_numbers<[1], [0], [0], [1], [0, 0, 1, 1], [], []>} : vector<16x32xf32>, vector<32x96xf32>, vector<16x96xf32> -> vector<16x96xf32>
    %7 = arith.addf %3, %6 : vector<16x96xf32>
    %c0_6 = arith.constant 0 : index
    %c0_7 = arith.constant 0 : index
    %8 = vector.load %arg6[%c0_6, %c0_7] : memref<16x96xf32, #tpu.memory_space<vmem>>, vector<16x96xf32>
    tpu.vector_store %arg6[%c0_6, %c0_7], %7 {strides = array<i32>} : memref<16x96xf32, #tpu.memory_space<vmem>>, vector<16x96xf32>,
    %c0_i32_8 = arith.constant 0 : i32
    %9 = arith.cmpi eq, %arg2, %c0_i32_8 : i32
    %10 = arith.extui %9 : i1 to i32
    %c0_i32_9 = arith.constant 0 : i32
    %11 = arith.cmpi ne, %10, %c0_i32_9 : i32
    scf.if %11 {
      %c0_10 = arith.constant 0 : index
      %c0_11 = arith.constant 0 : index
      %12 = vector.load %arg6[%c0_10, %c0_11] : memref<16x96xf32, #tpu.memory_space<vmem>>, vector<16x96xf32>
      %c0_12 = arith.constant 0 : index
      %c0_13 = arith.constant 0 : index
      %13 = vector.load %arg5[%c0_12, %c0_13] : memref<16x96xf32, #tpu.memory_space<vmem>>, vector<16x96xf32>
      tpu.vector_store %arg5[%c0_12, %c0_13], %12 {strides = array<i32>} : memref<16x96xf32, #tpu.memory_space<vmem>>, vector<16x96xf32>,
    } else {
    }
    return
  }
  func.func @transform_0(%arg0: i32, %arg1: i32, %arg2: i32) -> (i32, i32) {
    %c0_i32 = arith.constant 0 : i32
    return %arg0, %arg2 : i32, i32
  }
  func.func @transform_1(%arg0: i32, %arg1: i32, %arg2: i32) -> (i32, i32) {
    %c0_i32 = arith.constant 0 : i32
    return %arg2, %arg1 : i32, i32
  }
  func.func @transform_2(%arg0: i32, %arg1: i32, %arg2: i32) -> (i32, i32) {
    %c0_i32 = arith.constant 0 : i32
    return %arg0, %arg1 : i32, i32
  }
}

</mosaic_0001>

<bundles_post_ra>
// kernel: tpu_custom_call.1
= control target key start
LH: loop header
LB: loop body
LE: loop exit
PB: predicated region body
PF: predicated region fallthrough
CT: control target
= control target key end

     0   :  { %7 = vsyncpa [#allocation4], 0  ;;  %s344_s0 = inlined_call_operand.hbm [shape: f32[16,32], index: 0, kind: input, shape index: {}]   ;;  %s345_s1 = inlined_call_operand.hbm [shape: f32[32,96], index: 1, kind: input, shape index: {}]   ;;  %s346_s2 = inlined_call_operand.hbm [shape: f32[16,96], index: 2, kind: output, shape index: {}]  }
   0x1   :  { %8 = vsyncpa [#allocation7], 0 }
   0x2   :  { %9 = vsyncpa [#allocation5], 0  ;;  %s272_s9 = smov [#allocation3]   ;;  %s200_s13 = scalar_lea.hbm %s344_s0, 256 }
   0x3   :  { %s15_s10 = sshll.u32 %s272_s9, 4  ;;  %p201_p0 = scmp.ne.s32.totalorder %s344_s0, %s200_s13  ;;  %s16_s10 = int_to_ptr.vmem [resolvable:$true] %s15_s10 }
   0x4   :  { %p204_p1 = scmp.lt.u32.totalorder %s200_s13, %s344_s0 }
   0x6   :  { %p206_p2 = pnand %p204_p1, %p201_p0 }
   0x8   :  { %209 = shalt.err (!%p206_p2)
}
   0x9   :  { %s210_s18 = scalar_lea.vmem %s16_s10, 256  ;;  %p215_p4 = scmp.lt.s32.totalorder %s16_s10, %s16_s10 }
   0xa   :  { %p211_p3 = scmp.ne.s32.totalorder %s16_s10, %s210_s18  ;;  %p216_p5 = scmp.lt.s32.totalorder %s210_s18, %s210_s18 }
   0xc   :  { %p217_p6 = por %p216_p5, %p215_p4 }
   0xe   :  { %p218_p7 = pnand %p217_p6, %p211_p3 }
  0x10   :  { %221 = shalt.err (!%p218_p7)
}
  0x11   :  { %s273_s19 = smov 128   ;;  %s274_s20 = smov 8  }
  0x12   :  { %21 = dma.hbm_to_vmem [thread:$0]  %s344_s0, 256, %s16_s10, [#allocation4], %s273_s19, %s273_s19, %s274_s20  }
  0x13   :  { %s275_s23 = smov [#allocation6]   ;;  %s222_s27 = scalar_lea.hbm %s345_s1, 512 }
  0x14   :  { %s27_s24 = sshll.u32 %s275_s23, 4  ;;  %p223_p8 = scmp.ne.s32.totalorder %s345_s1, %s222_s27  ;;  %s28_s24 = int_to_ptr.vmem [resolvable:$true] %s27_s24 }
  0x15   :  { %p226_p9 = scmp.lt.u32.totalorder %s222_s27, %s345_s1 }
  0x17   :  { %p228_p10 = pnand %p226_p9, %p223_p8 }
  0x19   :  { %231 = shalt.err (!%p228_p10)
}
  0x1a   :  { %s232_s4 = scalar_lea.vmem %s28_s24, 512  ;;  %p237_p12 = scmp.lt.s32.totalorder %s28_s24, %s28_s24 }
  0x1b   :  { %p233_p11 = scmp.ne.s32.totalorder %s28_s24, %s232_s4  ;;  %p238_p13 = scmp.lt.s32.totalorder %s232_s4, %s232_s4 }
  0x1d   :  { %p239_p0 = por %p238_p13, %p237_p12 }
  0x1f   :  { %p240_p1 = pnand %p239_p0, %p233_p11 }
  0x21   :  { %243 = shalt.err (!%p240_p1)
}
  0x22   :  { %33 = dma.hbm_to_vmem [thread:$0]  %s345_s1, 512, %s28_s24, [#allocation7], %s273_s19, %s273_s19, %s274_s20  }
  0x23   :  { %266 = dma.done.wait [#allocation4], 256  }
  0x24   :  { %267 = vsyncadd [#allocation4], 4294967040 }
  0x25   :  { %268 = dma.done.wait [#allocation7], 512  }
  0x26   :  { %269 = vsyncadd [#allocation7], 4294966784  ;;  %vm44_vm0 = vcmask 785408   ;;  %v276_v0 = vmov 0.0   ;;  %vm55_vm1 = vcmask 261120   ;;  %v51_v1 = vld [vmem:[#allocation6] sm:$0xff] }
  0x27   :  { %46 = vst.msk [vmem:[#allocation2 + $0x8] sm:$0xff] %vm44_vm0, %v276_v0  ;;  %45 = vst.msk [vmem:[#allocation2] sm:$0xff] %vm44_vm0, %v276_v0  ;;  %v52_v2 = vld [vmem:[#allocation6 + $0x8] sm:$0xff]  ;;  %v53_v3 = vld [vmem:[#allocation6 + $0x10] sm:$0xff]  ;;  %s277_s1 = smov [#allocation8]  }
  0x28   :  { %v186_v4 = vpack.c.bf16 %v52_v2, %v51_v1  ;;  %v54_v5 = vld [vmem:[#allocation6 + $0x18] sm:$0xff]  ;;  %v49_v6 = vld [vmem:[#allocation3] sm:$0xff]  ;;  %s154_s6 = sshll.u32 %s277_s1, 4  ;;  %s155_s6 = int_to_ptr.vmem [resolvable:$true] %s154_s6 }
  0x29   :  { %v190_v7 = vpack.c.bf16 %v54_v5, %v53_v3  ;;  %183 = vmatprep.mubr.msk.f32.mxu0 %vm55_vm1, %v49_v6  ;;  %v50_v8 = vld [vmem:[#allocation3 + $0x8] sm:$0xff]  ;;  %s244_s7 = scalar_lea.vmem %s155_s6, 256  ;;  %p249_p3 = scmp.lt.s32.totalorder %s155_s6, %s155_s6 }
  0x2a   :  { %187 = vmatprep.subr.bf16.mxu0 %v186_v4  ;;  %p245_p2 = scmp.ne.s32.totalorder %s155_s6, %s244_s7  ;;  %p250_p4 = scmp.lt.s32.totalorder %s244_s7, %s244_s7 }
  0x2b   :  { %189 = vmatpush3.bf16.msra.mxu0 %v186_v4 }
  0x2c   :  { %191 = vmatprep.subr.bf16.mxu0 %v190_v7  ;;  %p251_p5 = por %p250_p4, %p249_p3 }
  0x2e   :  { %v48_v9 = vld [vmem:[#allocation2 + $0x8] sm:$0xff]  ;;  %v47_v10 = vld [vmem:[#allocation2] sm:$0xff]  ;;  %p252_p6 = pnand %p251_p5, %p245_p2 }
  0x2f   :  { %193 = vmatpush3.bf16.msra.mxu0 %v190_v7 }
  0x32   :  { %184 = vmatmul.mubr.msk.f32.vlgmr.msra.gmra.mrb[0].mxu0 %vm55_vm1, %v50_v8 }
 0x105   :  { %v185_v11 = vpop.f32.mrb[0].mxu0 }
 0x106   :  { %v138_v12 = vadd.f32 %v185_v11, %v48_v9  ;;  %v128_v13 = vpop.f32.mrb[1].mxu0 }
 0x107   :  { %v137_v14 = vadd.f32 %v128_v13, %v47_v10 }
 0x108   :  { %141 = vst.msk [vmem:[#allocation2 + $0x8] sm:$0xff] %vm44_vm0, %v138_v12 }
 0x109   :  { %140 = vst.msk [vmem:[#allocation2] sm:$0xff] %vm44_vm0, %v137_v14 }
 0x10f   :  { %v146_v15 = vld [vmem:[#allocation2 + $0x8] sm:$0xff] }
 0x110   :  { %v145_v16 = vld [vmem:[#allocation2] sm:$0xff]  ;;  %148 = vst.msk [vmem:[#allocation8 + $0x8] sm:$0xff] %vm44_vm0, %v146_v15 }
 0x111   :  { %147 = vst.msk [vmem:[#allocation8] sm:$0xff] %vm44_vm0, %v145_v16 }
 0x112   :  { %255 = shalt.err (!%p252_p6)
}
 0x113   :  { %s256_s10 = scalar_lea.hbm %s346_s2, 256 }
 0x114   :  { %p257_p7 = scmp.ne.s32.totalorder %s346_s2, %s256_s10  ;;  %p260_p8 = scmp.lt.u32.totalorder %s256_s10, %s346_s2 }
 0x116   :  { %p262_p9 = pnand %p260_p8, %p257_p7 }
 0x118   :  { %265 = shalt.err (!%p262_p9)
}
 0x119   :  { %160 = dma.vmem_to_hbm [thread:$0]  %s155_s6, 256, %s346_s2, [#allocation5], %s273_s19, %s273_s19, %s274_s20  }
 0x11a   :  { %270 = dma.done.wait [#allocation5], 256  }
 0x11b   :  { %271 = vsyncadd [#allocation5], 4294967040 }
 0x11c   :  { %164 = vsyncpa [#allocation4], 1 }
 0x11d   :  { %165 = vsyncpa [#allocation7], 1 }
 0x11e   :  { %166 = vsyncpa [#allocation5], 1 }

</bundles_post_ra>
